<compile_context>
chip_gen: v6e
topology: v6e:2x2x1
jax: 0.10.0
libtpu: 0.0.40
codegen_flags: <defaults>
</compile_context>

<pallas_src>
import jax
import jax.numpy as jnp
from jax.experimental import pallas as pl
from jax.experimental.pallas import tpu as pltpu


def _round_up(n, m):
    return ((n + m - 1) // m) * m


def _mlp_encoder_kernel(x_ref, w1_ref, b1_ref, w2_ref, b2_ref, mu_ref, lv_ref):
    # fc + ReLU: bf16 x bf16 -> f32 accumulate on the MXU, epilogue in f32.
    h = jnp.dot(x_ref[...], w1_ref[...], preferred_element_type=jnp.float32)
    h = jnp.maximum(h + b1_ref[...], 0.0)
    hb = h.astype(jnp.bfloat16)

    # fc2 as a single fused matmul; the mu/logvar split boundary is 128-aligned
    # so the two column slices below are free (no relayout).
    out = jnp.dot(hb, w2_ref[...], preferred_element_type=jnp.float32) + b2_ref[...]

    n = mu_ref.shape[-1]
    mu_ref[...] = out[:, :n].astype(mu_ref.dtype)
    lv_ref[...] = out[:, n:].astype(lv_ref.dtype)


def mlp_encoder(x, w1, b1, w2, b2, outdim):
    """x: (B, indim); w1: (indim, hiddim); b1: (hiddim,);
    w2: (hiddim, 2*outdim); b2: (2*outdim,). Returns (mu, logvar)."""
    B, indim = x.shape
    hiddim = w1.shape[1]
    out2 = w2.shape[1]
    assert out2 == 2 * outdim

    # --- lane-dense padding (multiples of 128 on feature axes) -------------
    indim_p = _round_up(indim, 128)
    hiddim_p = _round_up(hiddim, 128)
    outdim_p = _round_up(outdim, 128)

    # --- batch tile: stream x/out, keep weights resident --------------------
    if B >= 512:
        tm = 512
    elif B >= 256:
        tm = 256
    else:
        tm = _round_up(B, 8)           # sublane-aligned single tile

    # Simple VMEM budget check (double-buffered streamed operands + resident
    # weights); halve the batch tile if we would exceed ~48 MiB.
    def _vmem_bytes(tile_m):
        streamed = 2 * (tile_m * indim_p * 2            # x tile, bf16
                        + 2 * tile_m * outdim_p * 4)    # mu + logvar tiles, f32
        resident = (indim_p * hiddim_p * 2              # W1 bf16
                    + hiddim_p * 2 * outdim_p * 2       # W2 bf16
                    + hiddim_p * 4 + 2 * outdim_p * 4)  # biases f32
        return streamed + resident

    while tm > 8 and _vmem_bytes(tm) > 48 * 1024 * 1024:
        tm = max(8, _round_up(tm // 2, 8))

    B_p = _round_up(B, tm)
    grid = (B_p // tm,)

    # --- cast + zero-pad operands (bf16 operands halve HBM bytes) -----------
    xb = jnp.pad(x.astype(jnp.bfloat16), ((0, B_p - B), (0, indim_p - indim)))
    w1b = jnp.pad(w1.astype(jnp.bfloat16),
                  ((0, indim_p - indim), (0, hiddim_p - hiddim)))
    b1p = jnp.pad(b1.astype(jnp.float32), (0, hiddim_p - hiddim)).reshape(1, hiddim_p)

    # Pad each half of W2 / b2 separately, then concatenate, so the mu half
    # occupies columns [0, outdim_p) and the logvar half [outdim_p, 2*outdim_p).
    w2_mu, w2_lv = w2[:, :outdim], w2[:, outdim:]
    b2_mu, b2_lv = b2[:outdim], b2[outdim:]
    w2b = jnp.concatenate(
        [jnp.pad(w2_mu.astype(jnp.bfloat16),
                 ((0, hiddim_p - hiddim), (0, outdim_p - outdim))),
         jnp.pad(w2_lv.astype(jnp.bfloat16),
                 ((0, hiddim_p - hiddim), (0, outdim_p - outdim)))],
        axis=1)
    b2p = jnp.concatenate(
        [jnp.pad(b2_mu.astype(jnp.float32), (0, outdim_p - outdim)),
         jnp.pad(b2_lv.astype(jnp.float32), (0, outdim_p - outdim))],
        axis=0).reshape(1, 2 * outdim_p)

    flops = 2 * B_p * (indim_p * hiddim_p + hiddim_p * 2 * outdim_p)
    bytes_accessed = (xb.size * 2 + w1b.size * 2 + w2b.size * 2
                      + b1p.size * 4 + b2p.size * 4
                      + 2 * B_p * outdim_p * 4)

    mu_p, lv_p = pl.pallas_call(
        _mlp_encoder_kernel,
        out_shape=(
            jax.ShapeDtypeStruct((B_p, outdim_p), jnp.float32),
            jax.ShapeDtypeStruct((B_p, outdim_p), jnp.float32),
        ),
        grid=grid,
        in_specs=[
            pl.BlockSpec((tm, indim_p), lambda i: (i, 0)),            # x: streams
            pl.BlockSpec((indim_p, hiddim_p), lambda i: (0, 0)),      # W1: resident
            pl.BlockSpec((1, hiddim_p), lambda i: (0, 0)),            # b1: resident
            pl.BlockSpec((hiddim_p, 2 * outdim_p), lambda i: (0, 0)),  # W2: resident
            pl.BlockSpec((1, 2 * outdim_p), lambda i: (0, 0)),         # b2: resident
        ],
        out_specs=(
            pl.BlockSpec((tm, outdim_p), lambda i: (i, 0)),           # mu tile
            pl.BlockSpec((tm, outdim_p), lambda i: (i, 0)),           # logvar tile
        ),
        compiler_params=pltpu.CompilerParams(
            dimension_semantics=("parallel",),
        ),
        cost_estimate=pl.CostEstimate(
            flops=flops, transcendentals=0, bytes_accessed=bytes_accessed),
    )(xb, w1b, b1p, w2b, b2p)

    # Strip padding (rows beyond B, lanes beyond outdim). The mu/logvar split
    # already happened inside the kernel on a lane-aligned boundary.
    return mu_p[:B, :outdim], lv_p[:B, :outdim]


def _reference_f32(x, w1, b1, w2, b2, outdim):
    h = jnp.maximum(x @ w1 + b1, 0.0)
    o = h @ w2 + b2
    return o[:, :outdim], o[:, outdim:]


def _reference_bf16(x, w1, b1, w2, b2, outdim):
    # Same precision recipe as the kernel: bf16 operands, f32 accumulation,
    # f32 bias/ReLU epilogue.
    h = jnp.dot(x.astype(jnp.bfloat16), w1.astype(jnp.bfloat16),
                preferred_element_type=jnp.float32) + b1
    h = jnp.maximum(h, 0.0)
    o = jnp.dot(h.astype(jnp.bfloat16), w2.astype(jnp.bfloat16),
                preferred_element_type=jnp.float32) + b2
    return o[:, :outdim], o[:, outdim:]


if __name__ == "__main__":
    # Small shapes consistent with the module.
    batch, indim, hiddim, outdim = 2, 16, 32, 8

    key = jax.random.PRNGKey(0)
    k_x, k_w1, k_b1, k_w2, k_b2 = jax.random.split(key, 5)

    x = jax.random.normal(k_x, (batch, indim), dtype=jnp.float32)

    # PyTorch Linear weight is (out, in); we store the transposed (in, out)
    # form directly for the kernel (plain x @ W on the MXU).
    lim1 = 1.0 / (indim ** 0.5)
    w1 = jax.random.uniform(k_w1, (indim, hiddim), jnp.float32, -lim1, lim1)
    b1 = jax.random.uniform(k_b1, (hiddim,), jnp.float32, -lim1, lim1)
    lim2 = 1.0 / (hiddim ** 0.5)
    w2 = jax.random.uniform(k_w2, (hiddim, 2 * outdim), jnp.float32, -lim2, lim2)
    b2 = jax.random.uniform(k_b2, (2 * outdim,), jnp.float32, -lim2, lim2)

    mu, logvar = mlp_encoder(x, w1, b1, w2, b2, outdim)
    mu = jax.block_until_ready(mu)
    logvar = jax.block_until_ready(logvar)

    assert mu.shape == (batch, outdim) and logvar.shape == (batch, outdim)

    # Tight check against a same-precision (bf16 operand, f32 accum) reference.
    mu_rb, lv_rb = _reference_bf16(x, w1, b1, w2, b2, outdim)
    assert jnp.allclose(mu, mu_rb, atol=1e-3, rtol=1e-3)
    assert jnp.allclose(logvar, lv_rb, atol=1e-3, rtol=1e-3)

    # Loose check against the full-f32 reference (bf16 operand rounding only).
    mu_rf, lv_rf = _reference_f32(x, w1, b1, w2, b2, outdim)
    assert jnp.allclose(mu, mu_rf, atol=5e-2, rtol=5e-2)
    assert jnp.allclose(logvar, lv_rf, atol=5e-2, rtol=5e-2)

    print("KERNEL_OK")
</pallas_src>

<mosaic_0001>
module attributes {stable_mosaic.version = 11 : i64} {
  func.func @_mlp_encoder_kernel(%arg0: i32, %arg1: memref<8x128xbf16, #tpu.memory_space<vmem>>, %arg2: memref<128x128xbf16, #tpu.memory_space<vmem>>, %arg3: memref<1x128xf32, #tpu.memory_space<vmem>>, %arg4: memref<128x256xbf16, #tpu.memory_space<vmem>>, %arg5: memref<1x256xf32, #tpu.memory_space<vmem>>, %arg6: memref<8x128xf32, #tpu.memory_space<vmem>>, %arg7: memref<8x128xf32, #tpu.memory_space<vmem>>) attributes {dimension_semantics = [#tpu.dimension_semantics<parallel>], iteration_bounds = array<i64: 1>, scalar_prefetch = 0 : i64, scratch_operands = 0 : i64, tpu.core_type = #tpu.core_type<tc>, window_params = [{transform_indices = @transform_0, window_bounds = array<i64: 8, 128>}, {pipeline_mode = #tpu.pipeline_mode<synchronous>, transform_indices = @transform_1, window_bounds = array<i64: 128, 128>}, {pipeline_mode = #tpu.pipeline_mode<synchronous>, transform_indices = @transform_2, window_bounds = array<i64: 1, 128>}, {pipeline_mode = #tpu.pipeline_mode<synchronous>, transform_indices = @transform_3, window_bounds = array<i64: 128, 256>}, {pipeline_mode = #tpu.pipeline_mode<synchronous>, transform_indices = @transform_4, window_bounds = array<i64: 1, 256>}, {transform_indices = @transform_5, window_bounds = array<i64: 8, 128>}, {transform_indices = @transform_6, window_bounds = array<i64: 8, 128>}]} {
    %c0 = arith.constant 0 : index
    %c0_0 = arith.constant 0 : index
    %0 = vector.load %arg1[%c0, %c0_0] : memref<8x128xbf16, #tpu.memory_space<vmem>>, vector<8x128xbf16>
    %c0_1 = arith.constant 0 : index
    %c0_2 = arith.constant 0 : index
    %1 = vector.load %arg2[%c0_1, %c0_2] : memref<128x128xbf16, #tpu.memory_space<vmem>>, vector<128x128xbf16>
    %cst = arith.constant dense<0.000000e+00> : vector<8x128xf32>
    %2 = tpu.matmul %0, %1, %cst {dimension_numbers = #tpu.dot_dimension_numbers<[1], [0], [0], [1], [0, 0, 1, 1], [], []>} : vector<8x128xbf16>, vector<128x128xbf16>, vector<8x128xf32> -> vector<8x128xf32>
    %c0_3 = arith.constant 0 : index
    %c0_4 = arith.constant 0 : index
    %3 = vector.load %arg3[%c0_3, %c0_4] : memref<1x128xf32, #tpu.memory_space<vmem>>, vector<1x128xf32>
    %4 = vector.broadcast %3 : vector<1x128xf32> to vector<8x128xf32>
    %5 = arith.addf %2, %4 : vector<8x128xf32>
    %cst_5 = arith.constant 0.000000e+00 : f32
    %6 = vector.broadcast %cst_5 : f32 to vector<8x128xf32>
    %7 = arith.maximumf %5, %6 : vector<8x128xf32>
    %8 = arith.truncf %7 : vector<8x128xf32> to vector<8x128xbf16>
    %c0_6 = arith.constant 0 : index
    %c0_7 = arith.constant 0 : index
    %9 = vector.load %arg4[%c0_6, %c0_7] : memref<128x256xbf16, #tpu.memory_space<vmem>>, vector<128x256xbf16>
    %cst_8 = arith.constant dense<0.000000e+00> : vector<8x256xf32>
    %10 = tpu.matmul %8, %9, %cst_8 {dimension_numbers = #tpu.dot_dimension_numbers<[1], [0], [0], [1], [0, 0, 1, 1], [], []>} : vector<8x128xbf16>, vector<128x256xbf16>, vector<8x256xf32> -> vector<8x256xf32>
    %c0_9 = arith.constant 0 : index
    %c0_10 = arith.constant 0 : index
    %11 = vector.load %arg5[%c0_9, %c0_10] : memref<1x256xf32, #tpu.memory_space<vmem>>, vector<1x256xf32>
    %12 = vector.broadcast %11 : vector<1x256xf32> to vector<8x256xf32>
    %13 = arith.addf %10, %12 : vector<8x256xf32>
    %14 = vector.extract_strided_slice %13 {offsets = [0, 0], sizes = [8, 128], strides = [1, 1]} : vector<8x256xf32> to vector<8x128xf32>
    %c0_11 = arith.constant 0 : index
    %c0_12 = arith.constant 0 : index
    %15 = vector.load %arg6[%c0_11, %c0_12] : memref<8x128xf32, #tpu.memory_space<vmem>>, vector<8x128xf32>
    tpu.vector_store %arg6[%c0_11, %c0_12], %14 {strides = array<i32>} : memref<8x128xf32, #tpu.memory_space<vmem>>, vector<8x128xf32>,
    %16 = vector.extract_strided_slice %13 {offsets = [0, 128], sizes = [8, 128], strides = [1, 1]} : vector<8x256xf32> to vector<8x128xf32>
    %c0_13 = arith.constant 0 : index
    %c0_14 = arith.constant 0 : index
    %17 = vector.load %arg7[%c0_13, %c0_14] : memref<8x128xf32, #tpu.memory_space<vmem>>, vector<8x128xf32>
    tpu.vector_store %arg7[%c0_13, %c0_14], %16 {strides = array<i32>} : memref<8x128xf32, #tpu.memory_space<vmem>>, vector<8x128xf32>,
    return
  }
  func.func @transform_0(%arg0: i32) -> (i32, i32) {
    %c0_i32 = arith.constant 0 : i32
    %c0_i32_0 = arith.constant 0 : i32
    return %arg0, %c0_i32 : i32, i32
  }
  func.func @transform_1(%arg0: i32) -> (i32, i32) {
    %c0_i32 = arith.constant 0 : i32
    %c0_i32_0 = arith.constant 0 : i32
    %c0_i32_1 = arith.constant 0 : i32
    return %c0_i32, %c0_i32_0 : i32, i32
  }
  func.func @transform_2(%arg0: i32) -> (i32, i32) {
    %c0_i32 = arith.constant 0 : i32
    %c0_i32_0 = arith.constant 0 : i32
    %c0_i32_1 = arith.constant 0 : i32
    return %c0_i32, %c0_i32_0 : i32, i32
  }
  func.func @transform_3(%arg0: i32) -> (i32, i32) {
    %c0_i32 = arith.constant 0 : i32
    %c0_i32_0 = arith.constant 0 : i32
    %c0_i32_1 = arith.constant 0 : i32
    return %c0_i32, %c0_i32_0 : i32, i32
  }
  func.func @transform_4(%arg0: i32) -> (i32, i32) {
    %c0_i32 = arith.constant 0 : i32
    %c0_i32_0 = arith.constant 0 : i32
    %c0_i32_1 = arith.constant 0 : i32
    return %c0_i32, %c0_i32_0 : i32, i32
  }
  func.func @transform_5(%arg0: i32) -> (i32, i32) {
    %c0_i32 = arith.constant 0 : i32
    %c0_i32_0 = arith.constant 0 : i32
    return %arg0, %c0_i32 : i32, i32
  }
  func.func @transform_6(%arg0: i32) -> (i32, i32) {
    %c0_i32 = arith.constant 0 : i32
    %c0_i32_0 = arith.constant 0 : i32
    return %arg0, %c0_i32 : i32, i32
  }
}

</mosaic_0001>

<bundles_post_ra>
// kernel: tpu_custom_call.1
= control target key start
LH: loop header
LB: loop body
LE: loop exit
PB: predicated region body
PF: predicated region fallthrough
CT: control target
= control target key end

     0   :  { %12 = vsyncpa [#allocation3], 0  ;;  %s633_s0 = inlined_call_operand.hbm [shape: bf16[8,128], index: 0, kind: input, shape index: {}]   ;;  %s634_s1 = inlined_call_operand.hbm [shape: bf16[128,128], index: 1, kind: input, shape index: {}]   ;;  %s635_s2 = inlined_call_operand.vmem [shape: f32[1,128], index: 2, kind: input, shape index: {}]   ;;  %s636_s3 = inlined_call_operand.hbm [shape: bf16[128,256], index: 3, kind: input, shape index: {}]   ;;  %s637_s4 = inlined_call_operand.vmem [shape: f32[1,256], index: 4, kind: input, shape index: {}]   ;;  %s638_s5 = inlined_call_operand.hbm [shape: f32[8,128], index: 5, kind: output, shape index: {0}]   ;;  %s639_s6 = inlined_call_operand.hbm [shape: f32[8,128], index: 6, kind: output, shape index: {1}]  }
   0x1   :  { %13 = vsyncpa [#allocation6], 0 }
   0x2   :  { %14 = vsyncpa [#allocation4], 0 }
   0x3   :  { %15 = vsyncpa [#allocation10], 0  ;;  %s565_s21 = smov [#allocation5]  }
   0x4   :  { %s31_s22 = sshll.u32 %s565_s21, 4  ;;  %s32_s22 = int_to_ptr.vmem [resolvable:$true] %s31_s22 }
   0x5   :  { %s465_s23 = scalar_lea.vmem %s32_s22, 1024  ;;  %p470_p1 = scmp.lt.s32.totalorder %s32_s22, %s32_s22 }
   0x6   :  { %p466_p0 = scmp.ne.s32.totalorder %s32_s22, %s465_s23  ;;  %p471_p2 = scmp.lt.s32.totalorder %s465_s23, %s465_s23 }
   0x8   :  { %p472_p3 = por %p471_p2, %p470_p1 }
   0xa   :  { %p473_p4 = pnand %p472_p3, %p466_p0 }
   0xc   :  { %476 = shalt.err (!%p473_p4)
}
   0xd   :  { %s566_s24 = smov 64   ;;  %s567_s25 = smov 4  }
   0xe   :  { %37 = dma.hbm_to_vmem [thread:$0]  %s634_s1, 1024, %s32_s22, [#allocation6], %s566_s24, %s566_s24, %s567_s25  }
   0xf   :  { %s568_s28 = smov [#allocation2]   ;;  %s569_s30 = smov [#allocation7]  }
  0x10   :  { %s22_s29 = sshll.u32 %s568_s28, 4  ;;  %s45_s7 = sshll.u32 %s569_s30, 4  ;;  %s23_s29 = int_to_ptr.vmem [resolvable:$true] %s22_s29  ;;  %s46_s7 = int_to_ptr.vmem [resolvable:$true] %s45_s7 }
  0x11   :  { %s485_s8 = scalar_lea.vmem %s23_s29, 64  ;;  %p490_p6 = scmp.lt.s32.totalorder %s23_s29, %s23_s29 }
  0x12   :  { %p486_p5 = scmp.ne.s32.totalorder %s23_s29, %s485_s8  ;;  %p491_p7 = scmp.lt.s32.totalorder %s485_s8, %s485_s8 }
  0x14   :  { %p492_p8 = por %p491_p7, %p490_p6 }
  0x16   :  { %p493_p9 = pnand %p492_p8, %p486_p5 }
  0x18   :  { %496 = shalt.err (!%p493_p9)
}
  0x19   :  { %25 = dma.hbm_to_vmem [thread:$0]  %s633_s0, 64, %s23_s29, [#allocation3]  }
  0x1a   :  { %s505_s11 = scalar_lea.vmem %s46_s7, 2048  ;;  %p510_p11 = scmp.lt.s32.totalorder %s46_s7, %s46_s7 }
  0x1b   :  { %p506_p10 = scmp.ne.s32.totalorder %s46_s7, %s505_s11  ;;  %p511_p12 = scmp.lt.s32.totalorder %s505_s11, %s505_s11 }
  0x1d   :  { %p512_p13 = por %p511_p12, %p510_p11 }
  0x1f   :  { %p513_p0 = pnand %p512_p13, %p506_p10 }
  0x21   :  { %516 = shalt.err (!%p513_p0)
}
  0x22   :  { %s570_s1 = smov 128   ;;  %s571_s12 = smov 8  }
  0x23   :  { %51 = dma.hbm_to_vmem [thread:$0]  %s636_s3, 2048, %s46_s7, [#allocation6], %s570_s1, %s570_s1, %s571_s12  }
  0x24   :  { %557 = dma.done.wait [#allocation3], 64  }
  0x25   :  { %558 = vsyncadd [#allocation3], 4294967232 }
  0x26   :  { %559 = dma.done.wait [#allocation6], 3072  }
  0x27   :  { %560 = vsyncadd [#allocation6], 4294964224  ;;  %v572_v0 = vmov 0.0   ;;  %vm573_vm0 = vmmov 0   ;;  %v425_v1 = vld [vmem:[#allocation5 + $0x38] sm:$0xff]   ;;  %v426_v2 = vld [vmem:[#allocation5 + $0x30] sm:$0xff]   ;;  %v196_v35 = vlaneseq }
  0x28   :  { %393 = vmatprep.subr.bf16.mxu0 %v572_v0  ;;  %409 = vmatprep.mubr.msk.bf16.mxu0 %vm573_vm0, %v572_v0  ;;  %v427_v3 = vld [vmem:[#allocation5 + $0x28] sm:$0xff]   ;;  %v433_v4 = vld [vmem:[#allocation7 + $0x74] ss:$8 sps:$4 sm:$0xff]   ;;  %v435_v5 = vld [vmem:[#allocation7 + $0x70] ss:$8 sps:$4 sm:$0xff]   ;;  %v574_v26 = vmov 0  }
  0x29   :  { %394 = vmatpush3.bf16.msra.mxu0 %v425_v1  ;;  %v428_v6 = vld [vmem:[#allocation5 + $0x20] sm:$0xff]   ;;  %286 = vmatprep.subr.bf16.mxu1 %v433_v4  ;;  %v439_v9 = vld [vmem:[#allocation7 + $0x54] ss:$8 sps:$4 sm:$0xff]   ;;  %v441_v11 = vld [vmem:[#allocation7 + $0x50] ss:$8 sps:$4 sm:$0xff]   ;;  %v197_v36 = vshrl.u32 %v196_v35, 7 }
  0x2a   :  { %395 = vmatprep.subr.bf16.mxu0 %v572_v0  ;;  %v436_v7 = vld [vmem:[#allocation7 + $0x64] ss:$8 sps:$4 sm:$0xff]   ;;  %287 = vmatpush1.bf16.msra.mxu1 %v435_v5  ;;  %v438_v8 = vld [vmem:[#allocation7 + $0x60] ss:$8 sps:$4 sm:$0xff]   ;;  %v429_v10 = vld [vmem:[#allocation5 + $0x18] sm:$0xff]   ;;  %s575_s17 = smov [#allocation8]  }
  0x2b   :  { %288 = vmatprep.subr.bf16.mxu1 %v436_v7  ;;  %v442_v12 = vld [vmem:[#allocation7 + $0x44] ss:$8 sps:$4 sm:$0xff]   ;;  %v430_v13 = vld [vmem:[#allocation5 + $0x10] sm:$0xff]   ;;  %v444_v14 = vld [vmem:[#allocation7 + $0x40] ss:$8 sps:$4 sm:$0xff]   ;;  %318 = vmatprep.mubr.bf16.mxu1 %v574_v26  ;;  %v198_v37 = vsub.s32 0, %v197_v36 }
  0x2c   :  { %v445_v15 = vld [vmem:[#allocation7 + $0x34] ss:$8 sps:$4 sm:$0xff]   ;;  %v431_v16 = vld [vmem:[#allocation5 + $0x8] sm:$0xff]   ;;  %v447_v17 = vld [vmem:[#allocation7 + $0x30] ss:$8 sps:$4 sm:$0xff]   ;;  %v202_v39 = vsub.s32 1, %v197_v36 }
  0x2d   :  { %396 = vmatpush3.bf16.msra.mxu0 %v426_v2  ;;  %v448_v18 = vld [vmem:[#allocation7 + $0x24] ss:$8 sps:$4 sm:$0xff]   ;;  %v450_v20 = vld [vmem:[#allocation7 + $0x20] ss:$8 sps:$4 sm:$0xff]   ;;  %v451_v21 = vld [vmem:[#allocation7 + $0x14] ss:$8 sps:$4 sm:$0xff]  }
  0x2e   :  { %397 = vmatprep.subr.bf16.mxu0 %v572_v0  ;;  %289 = vmatpush1.bf16.msra.mxu1 %v438_v8  ;;  %v432_v19 = vld [vmem:[#allocation5] sm:$0xff]   ;;  %v64_v22 = vld [vmem:[#allocation2] sm:$0xf]  ;;  %v453_v23 = vld [vmem:[#allocation7 + $0x10] ss:$8 sps:$4 sm:$0xff]   ;;  %s335_s18 = sshll.u32 %s575_s17, 4  ;;  %s336_s18 = int_to_ptr.vmem [resolvable:$true] %s335_s18 }
  0x2f   :  { %290 = vmatprep.subr.bf16.mxu1 %v439_v9  ;;  %v454_v24 = vld [vmem:[#allocation7 + $0x4] ss:$8 sps:$4 sm:$0xff]   ;;  %v456_v25 = vld [vmem:[#allocation7] ss:$8 sps:$4 sm:$0xff]   ;;  %v359_v27 = vld [vmem:[%s635_s2] ss:$0 sm:$0xff]  ;;  %p522_p2 = scmp.lt.s32.totalorder %s336_s18, %s336_s18 }
  0x30   :  { %v194_v38 = vld [vmem:[%s637_s4] sm:$0x3]  ;;  %s576_s2 = smov [#allocation9]   ;;  %s517_s20 = scalar_lea.vmem %s336_s18, 128 }
  0x31   :  { %398 = vmatpush3.bf16.msra.mxu0 %v427_v3  ;;  %v199_v40 = vrot.slane %v194_v38, %v198_v37  ;;  %v203_v41 = vrot.slane %v194_v38, %v202_v39  ;;  %s345_s19 = sshll.u32 %s576_s2, 4  ;;  %p518_p1 = scmp.ne.s32.totalorder %s336_s18, %s517_s20  ;;  %s346_s19 = int_to_ptr.vmem [resolvable:$true] %s345_s19 }
  0x32   :  { %399 = vmatprep.subr.bf16.mxu0 %v572_v0  ;;  %291 = vmatpush1.bf16.msra.mxu1 %v441_v11  ;;  %p523_p3 = scmp.lt.s32.totalorder %s517_s20, %s517_s20 }
  0x33   :  { %292 = vmatprep.subr.bf16.mxu1 %v442_v12 }
  0x34   :  { %p524_p4 = por %p523_p3, %p522_p2 }
  0x35   :  { %400 = vmatpush3.bf16.msra.mxu0 %v428_v6 }
  0x36   :  { %401 = vmatprep.subr.bf16.mxu0 %v572_v0  ;;  %293 = vmatpush1.bf16.msra.mxu1 %v444_v14  ;;  %p525_p5 = pnand %p524_p4, %p518_p1 }
  0x37   :  { %294 = vmatprep.subr.bf16.mxu1 %v445_v15 }
  0x39   :  { %402 = vmatpush3.bf16.msra.mxu0 %v429_v10 }
  0x3a   :  { %403 = vmatprep.subr.bf16.mxu0 %v572_v0  ;;  %295 = vmatpush1.bf16.msra.mxu1 %v447_v17 }
  0x3b   :  { %296 = vmatprep.subr.bf16.mxu1 %v448_v18 }
  0x3d   :  { %404 = vmatpush3.bf16.msra.mxu0 %v430_v13 }
  0x3e   :  { %405 = vmatprep.subr.bf16.mxu0 %v572_v0  ;;  %297 = vmatpush1.bf16.msra.mxu1 %v450_v20 }
  0x3f   :  { %298 = vmatprep.subr.bf16.mxu1 %v451_v21 }
  0x41   :  { %406 = vmatpush3.bf16.msra.mxu0 %v431_v16 }
  0x42   :  { %407 = vmatprep.subr.bf16.mxu0 %v572_v0  ;;  %299 = vmatpush1.bf16.msra.mxu1 %v453_v23 }
  0x43   :  { %300 = vmatprep.subr.bf16.mxu1 %v454_v24 }
  0x45   :  { %408 = vmatpush3.bf16.msra.mxu0 %v432_v19 }
  0x46   :  { %301 = vmatpush1.bf16.msra.mxu1 %v456_v25 }
  0x48   :  { %410 = vmatmul.mubr.bf16.vlgmr.msra.gmra.mxu0 %v64_v22 }
 0x108   :  { %v170_v28 = vpop.f32.mrf.mxu0 }
 0x109   :  { %v171_v29 = vadd.f32 %v359_v27, %v170_v28 }
 0x10a   :  { %v411_v30 = vpop.f32.mrf.mxu0 }
 0x10b   :  { %v176_v31 = vmax.f32 %v171_v29, 0.0 }
 0x10c   :  { %v173_v32 = vpop.f32.mrf.mxu0 }
 0x10d   :  { %v177_v33 = vpack.c.bf16 %v176_v31, %v176_v31 }
 0x10e   :  { %v412_v34 = vpop.f32.mrf.mxu0 }
 0x10f   :  { %319 = vmatmul.mubr.bf16.vlgmr.msra.gmra.mxu1 %v177_v33 }
 0x1cf   :  { %v320_v42 = vpop.f32.mrf.mxu1 }
 0x1d0   :  { %v321_v43 = vadd.f32 %v320_v42, %v199_v40 }
 0x1d1   :  { %v322_v44 = vpop.f32.mrf.mxu1 }
 0x1d2   :  { %327 = vst [vmem:[#allocation8] sm:$0xff] %v321_v43  ;;  %v323_v45 = vadd.f32 %v322_v44, %v203_v41 }
 0x1d3   :  { %v324_v46 = vpop.f32.mrf.mxu1 }
 0x1d4   :  { %528 = shalt.err (!%p525_p5)
}
 0x1d5   :  { %338 = dma.vmem_to_hbm [thread:$0]  %s336_s18, 128, %s638_s5, [#allocation4]   ;;  %328 = vst [vmem:[#allocation9] sm:$0xff] %v323_v45  ;;  %v325_v47 = vpop.f32.mrf.mxu1 }
 0x1d6   :  { %s537_s22 = scalar_lea.vmem %s346_s19, 128  ;;  %p542_p7 = scmp.lt.s32.totalorder %s346_s19, %s346_s19 }
 0x1d7   :  { %p538_p6 = scmp.ne.s32.totalorder %s346_s19, %s537_s22  ;;  %p543_p8 = scmp.lt.s32.totalorder %s537_s22, %s537_s22 }
 0x1d9   :  { %p544_p9 = por %p543_p8, %p542_p7 }
 0x1db   :  { %p545_p10 = pnand %p544_p9, %p538_p6 }
 0x1dd   :  { %548 = shalt.err (!%p545_p10)
}
 0x1de   :  { %348 = dma.vmem_to_hbm [thread:$0]  %s346_s19, 128, %s639_s6, [#allocation10]  }
 0x1df   :  { %561 = dma.done.wait [#allocation4], 128  }
 0x1e0   :  { %562 = vsyncadd [#allocation4], 4294967168 }
 0x1e1   :  { %563 = dma.done.wait [#allocation10], 128  }
 0x1e2   :  { %564 = vsyncadd [#allocation10], 4294967168 }
 0x1e3   :  { %355 = vsyncpa [#allocation3], 1 }
 0x1e4   :  { %356 = vsyncpa [#allocation6], 1 }
 0x1e5   :  { %357 = vsyncpa [#allocation4], 1 }
 0x1e6   :  { %358 = vsyncpa [#allocation10], 1 }

</bundles_post_ra>
